<compile_context>
chip_gen: v6e
topology: v6e:2x2x1
jax: 0.10.0
libtpu: 0.0.40
codegen_flags: <defaults>
</compile_context>

<pallas_src>
import numpy as np
import jax
import jax.numpy as jnp
from jax.experimental import pallas as pl
from jax.experimental.pallas import tpu as pltpu


def _pick_row_tile(C, R, L, budget_bytes=16 * 1024 * 1024):
    """Largest multiple-of-8 divisor of R whose double-buffered blocks fit budget."""
    def footprint(r):
        # 2 inputs * 2 pipeline buffers * (C*r*L*4B)  +  2 buffers * output (r*L*4B)
        return (2 * 2 * C + 2) * r * L * 4

    if footprint(R) <= budget_bytes:
        return R
    cands = [r for r in range(8, R, 8) if R % r == 0]
    fitting = [r for r in cands if footprint(r) <= budget_bytes]
    if fitting:
        return max(fitting)
    if cands:
        return min(cands)
    return R


def stbce_loss(crf_sm_mask, sm_mask, labels):
    """crf_sm_mask: (B,C,H,W) f32, sm_mask: (B,C,H,W) f32 in (0,1), labels: (B,C)."""
    B, C, H, W = sm_mask.shape
    HW = H * W

    # ---- lane-dense spatial layout: (H, W) -> (HW/128, 128) when possible ----
    if HW % 128 == 0:
        R_total, L = HW // 128, 128
    else:
        R_total, L = H, W
    crf2 = crf_sm_mask.reshape(B, C, R_total, L).astype(jnp.float32)
    sm2 = sm_mask.reshape(B, C, R_total, L).astype(jnp.float32)

    R_TILE = _pick_row_tile(C, R_total, L)
    n_tiles = R_total // R_TILE

    # ---- tiny per-batch scalar glue (labels -> presence + fallback class) ----
    present = (labels != 0).astype(jnp.int32)                      # (B, C)
    idx = jnp.arange(C, dtype=jnp.int32)
    big = jnp.int32(C + 1)
    masked = jnp.where(present != 0, idx[None, :], big)
    first = jnp.min(masked, axis=1)                                # cur_class[0]
    masked2 = jnp.where((present != 0) & (idx[None, :] > first[:, None]),
                        idx[None, :], big)
    second = jnp.min(masked2, axis=1)                              # cur_class[1]
    count = jnp.sum(present, axis=1)
    fallback = jnp.where(count == 2, second, first).astype(jnp.int32)  # (B,)

    # ---- Pallas kernel: argmax over C, pseudo-mask, single-log BCE map ----
    def kernel(present_ref, fallback_ref, crf_ref, sm_ref, out_ref):
        b = pl.program_id(0)
        fb = fallback_ref[b]

        # argmax over channel axis, first-max-wins (matches np.argmax)
        best = crf_ref[0, 0]
        pre = jnp.zeros((R_TILE, L), jnp.int32)
        for c in range(1, C):
            xc = crf_ref[0, c]
            better = xc > best
            best = jnp.where(better, xc, best)
            pre = jnp.where(better, jnp.int32(c), pre)

        # matched: pixels whose argmax class is present in labels[b]
        matched = jnp.zeros((R_TILE, L), jnp.bool_)
        for c in range(C):
            matched = matched | ((pre == c) & (present_ref[b, c] != 0))
        unmatched = jnp.logical_not(matched)

        # per-pixel BCE summed over channels; pse is 0/1 so one log suffices
        bce = jnp.zeros((R_TILE, L), jnp.float32)
        for c in range(C):
            pse = ((pre == c) & (present_ref[b, c] != 0)) | ((fb == c) & unmatched)
            p = sm_ref[0, c]
            p_sel = jnp.where(pse, p, 1.0 - p)
            bce = bce - jnp.maximum(jnp.log(p_sel), -100.0)
        out_ref[0] = bce

    grid_spec = pltpu.PrefetchScalarGridSpec(
        num_scalar_prefetch=2,
        grid=(B, n_tiles),
        in_specs=[
            pl.BlockSpec((1, C, R_TILE, L), lambda b, t, p, f: (b, 0, t, 0)),  # crf
            pl.BlockSpec((1, C, R_TILE, L), lambda b, t, p, f: (b, 0, t, 0)),  # sm
        ],
        out_specs=pl.BlockSpec((1, R_TILE, L), lambda b, t, p, f: (b, t, 0)),
    )

    bce_map = pl.pallas_call(
        kernel,
        grid_spec=grid_spec,
        out_shape=jax.ShapeDtypeStruct((B, R_total, L), jnp.float32),
        compiler_params=pltpu.CompilerParams(
            dimension_semantics=("parallel", "parallel"),
            vmem_limit_bytes=32 * 1024 * 1024),
    )(present, fallback, crf2, sm2)

    return jnp.sum(bce_map) / jnp.float32(B * C * H * W)


def _reference_numpy(crf, sm, labels):
    """Direct transcription of the PyTorch/numpy forward pass."""
    crf = np.asarray(crf); sm = np.asarray(sm); labels = np.asarray(labels)
    pse = np.zeros(sm.shape, dtype='float32')
    for i in range(sm.shape[0]):
        cur = np.nonzero(labels[i])[0]
        pre = np.argmax(crf[i], axis=0)
        for k in np.unique(pre):
            idx = pre == k
            if np.isin(cur, k).any():
                pse[i, k][idx] = 1.0
            else:
                tgt = cur[1] if len(cur) == 2 else cur[0]
                pse[i, tgt][idx] = 1.0
    bce = -(pse * np.maximum(np.log(sm), -100.0)
            + (1.0 - pse) * np.maximum(np.log(1.0 - sm), -100.0))
    return np.float32(bce.mean())


if __name__ == "__main__":
    B, C, H, W = 2, 4, 16, 16
    key = jax.random.PRNGKey(0)
    k1, k2 = jax.random.split(key)

    crf_sm_mask = jax.random.normal(k1, (B, C, H, W), dtype=jnp.float32)
    sm_mask = jax.nn.sigmoid(jax.random.normal(k2, (B, C, H, W), dtype=jnp.float32))
    # multi-hot labels: batch 0 has two classes (exercises fallback=cur_class[1]),
    # batch 1 has one class (fallback=cur_class[0]).
    labels = jnp.array([[1.0, 0.0, 1.0, 0.0],
                        [0.0, 1.0, 0.0, 0.0]], dtype=jnp.float32)

    loss = stbce_loss(crf_sm_mask, sm_mask, labels)
    loss = jax.block_until_ready(loss)

    ref = _reference_numpy(crf_sm_mask, sm_mask, labels)
    assert np.isclose(float(loss), float(ref), rtol=1e-4, atol=1e-5), (float(loss), float(ref))
    print("KERNEL_OK")
</pallas_src>

<mosaic_0001>
module attributes {stable_mosaic.version = 11 : i64} {
  func.func @kernel(%arg0: i32, %arg1: i32, %arg2: memref<2x4xi32, #tpu.memory_space<smem>>, %arg3: memref<2xi32, #tpu.memory_space<smem>>, %arg4: memref<1x4x2x128xf32, #tpu.memory_space<vmem>>, %arg5: memref<1x4x2x128xf32, #tpu.memory_space<vmem>>, %arg6: memref<1x2x128xf32, #tpu.memory_space<vmem>>) attributes {dimension_semantics = [#tpu.dimension_semantics<parallel>, #tpu.dimension_semantics<parallel>], iteration_bounds = array<i64: 2, 1>, scalar_prefetch = 2 : i64, scratch_operands = 0 : i64, tpu.core_type = #tpu.core_type<tc>, window_params = [{transform_indices = @transform_0, window_bounds = array<i64: 1, 4, 2, 128>}, {transform_indices = @transform_1, window_bounds = array<i64: 1, 4, 2, 128>}, {transform_indices = @transform_2, window_bounds = array<i64: 1, 2, 128>}]} {
    %0 = arith.index_cast %arg0 : i32 to index
    %1 = memref.load %arg3[%0] : memref<2xi32, #tpu.memory_space<smem>>
    %c0 = arith.constant 0 : index
    %c0_0 = arith.constant 0 : index
    %c0_1 = arith.constant 0 : index
    %c0_2 = arith.constant 0 : index
    %2 = vector.load %arg4[%c0, %c0_0, %c0_1, %c0_2] : memref<1x4x2x128xf32, #tpu.memory_space<vmem>>, vector<1x1x2x128xf32>
    %3 = vector.shape_cast %2 : vector<1x1x2x128xf32> to vector<2x128xf32>
    %c0_i32 = arith.constant 0 : i32
    %4 = vector.broadcast %c0_i32 : i32 to vector<2x128xi32>
    %c0_3 = arith.constant 0 : index
    %c1 = arith.constant 1 : index
    %c0_4 = arith.constant 0 : index
    %c0_5 = arith.constant 0 : index
    %5 = vector.load %arg4[%c0_3, %c1, %c0_4, %c0_5] : memref<1x4x2x128xf32, #tpu.memory_space<vmem>>, vector<1x1x2x128xf32>
    %6 = vector.shape_cast %5 : vector<1x1x2x128xf32> to vector<2x128xf32>
    %7 = arith.cmpf ogt, %6, %3 : vector<2x128xf32>
    %8 = arith.select %7, %6, %3 : vector<2x128xi1>, vector<2x128xf32>
    %c1_i32 = arith.constant 1 : i32
    %9 = vector.broadcast %c1_i32 : i32 to vector<2x128xi32>
    %10 = arith.select %7, %9, %4 : vector<2x128xi1>, vector<2x128xi32>
    %c0_6 = arith.constant 0 : index
    %c2 = arith.constant 2 : index
    %c0_7 = arith.constant 0 : index
    %c0_8 = arith.constant 0 : index
    %11 = vector.load %arg4[%c0_6, %c2, %c0_7, %c0_8] : memref<1x4x2x128xf32, #tpu.memory_space<vmem>>, vector<1x1x2x128xf32>
    %12 = vector.shape_cast %11 : vector<1x1x2x128xf32> to vector<2x128xf32>
    %13 = arith.cmpf ogt, %12, %8 : vector<2x128xf32>
    %14 = arith.select %13, %12, %8 : vector<2x128xi1>, vector<2x128xf32>
    %c2_i32 = arith.constant 2 : i32
    %15 = vector.broadcast %c2_i32 : i32 to vector<2x128xi32>
    %16 = arith.select %13, %15, %10 : vector<2x128xi1>, vector<2x128xi32>
    %c0_9 = arith.constant 0 : index
    %c3 = arith.constant 3 : index
    %c0_10 = arith.constant 0 : index
    %c0_11 = arith.constant 0 : index
    %17 = vector.load %arg4[%c0_9, %c3, %c0_10, %c0_11] : memref<1x4x2x128xf32, #tpu.memory_space<vmem>>, vector<1x1x2x128xf32>
    %18 = vector.shape_cast %17 : vector<1x1x2x128xf32> to vector<2x128xf32>
    %19 = arith.cmpf ogt, %18, %14 : vector<2x128xf32>
    %c3_i32 = arith.constant 3 : i32
    %20 = vector.broadcast %c3_i32 : i32 to vector<2x128xi32>
    %21 = arith.select %19, %20, %16 : vector<2x128xi1>, vector<2x128xi32>
    %false = arith.constant false
    %22 = vector.broadcast %false : i1 to vector<2x128xi1>
    %c0_i32_12 = arith.constant 0 : i32
    %23 = vector.broadcast %c0_i32_12 : i32 to vector<2x128xi32>
    %24 = arith.cmpi eq, %21, %23 : vector<2x128xi32>
    %25 = arith.index_cast %arg0 : i32 to index
    %c0_13 = arith.constant 0 : index
    %26 = memref.load %arg2[%25, %c0_13] : memref<2x4xi32, #tpu.memory_space<smem>>
    %c0_i32_14 = arith.constant 0 : i32
    %27 = arith.cmpi ne, %26, %c0_i32_14 : i32
    %28 = vector.broadcast %27 : i1 to vector<2x128xi1>
    %29 = arith.andi %24, %28 : vector<2x128xi1>
    %30 = arith.ori %22, %29 : vector<2x128xi1>
    %c1_i32_15 = arith.constant 1 : i32
    %31 = vector.broadcast %c1_i32_15 : i32 to vector<2x128xi32>
    %32 = arith.cmpi eq, %21, %31 : vector<2x128xi32>
    %33 = arith.index_cast %arg0 : i32 to index
    %c1_16 = arith.constant 1 : index
    %34 = memref.load %arg2[%33, %c1_16] : memref<2x4xi32, #tpu.memory_space<smem>>
    %c0_i32_17 = arith.constant 0 : i32
    %35 = arith.cmpi ne, %34, %c0_i32_17 : i32
    %36 = vector.broadcast %35 : i1 to vector<2x128xi1>
    %37 = arith.andi %32, %36 : vector<2x128xi1>
    %38 = arith.ori %30, %37 : vector<2x128xi1>
    %c2_i32_18 = arith.constant 2 : i32
    %39 = vector.broadcast %c2_i32_18 : i32 to vector<2x128xi32>
    %40 = arith.cmpi eq, %21, %39 : vector<2x128xi32>
    %41 = arith.index_cast %arg0 : i32 to index
    %c2_19 = arith.constant 2 : index
    %42 = memref.load %arg2[%41, %c2_19] : memref<2x4xi32, #tpu.memory_space<smem>>
    %c0_i32_20 = arith.constant 0 : i32
    %43 = arith.cmpi ne, %42, %c0_i32_20 : i32
    %44 = vector.broadcast %43 : i1 to vector<2x128xi1>
    %45 = arith.andi %40, %44 : vector<2x128xi1>
    %46 = arith.ori %38, %45 : vector<2x128xi1>
    %c3_i32_21 = arith.constant 3 : i32
    %47 = vector.broadcast %c3_i32_21 : i32 to vector<2x128xi32>
    %48 = arith.cmpi eq, %21, %47 : vector<2x128xi32>
    %49 = arith.index_cast %arg0 : i32 to index
    %c3_22 = arith.constant 3 : index
    %50 = memref.load %arg2[%49, %c3_22] : memref<2x4xi32, #tpu.memory_space<smem>>
    %c0_i32_23 = arith.constant 0 : i32
    %51 = arith.cmpi ne, %50, %c0_i32_23 : i32
    %52 = vector.broadcast %51 : i1 to vector<2x128xi1>
    %53 = arith.andi %48, %52 : vector<2x128xi1>
    %54 = arith.ori %46, %53 : vector<2x128xi1>
    %cst = arith.constant dense<true> : vector<2x128xi1>
    %55 = arith.xori %54, %cst : vector<2x128xi1>
    %cst_24 = arith.constant 0.000000e+00 : f32
    %56 = vector.broadcast %cst_24 : f32 to vector<2x128xf32>
    %c0_i32_25 = arith.constant 0 : i32
    %57 = vector.broadcast %c0_i32_25 : i32 to vector<2x128xi32>
    %58 = arith.cmpi eq, %21, %57 : vector<2x128xi32>
    %59 = arith.index_cast %arg0 : i32 to index
    %c0_26 = arith.constant 0 : index
    %60 = memref.load %arg2[%59, %c0_26] : memref<2x4xi32, #tpu.memory_space<smem>>
    %c0_i32_27 = arith.constant 0 : i32
    %61 = arith.cmpi ne, %60, %c0_i32_27 : i32
    %62 = vector.broadcast %61 : i1 to vector<2x128xi1>
    %63 = arith.andi %58, %62 : vector<2x128xi1>
    %c0_i32_28 = arith.constant 0 : i32
    %64 = arith.cmpi eq, %1, %c0_i32_28 : i32
    %65 = vector.broadcast %64 : i1 to vector<2x128xi1>
    %66 = arith.andi %65, %55 : vector<2x128xi1>
    %67 = arith.ori %63, %66 : vector<2x128xi1>
    %c0_29 = arith.constant 0 : index
    %c0_30 = arith.constant 0 : index
    %c0_31 = arith.constant 0 : index
    %c0_32 = arith.constant 0 : index
    %68 = vector.load %arg5[%c0_29, %c0_30, %c0_31, %c0_32] : memref<1x4x2x128xf32, #tpu.memory_space<vmem>>, vector<1x1x2x128xf32>
    %69 = vector.shape_cast %68 : vector<1x1x2x128xf32> to vector<2x128xf32>
    %cst_33 = arith.constant 1.000000e+00 : f32
    %70 = vector.broadcast %cst_33 : f32 to vector<2x128xf32>
    %71 = arith.subf %70, %69 : vector<2x128xf32>
    %72 = arith.select %67, %69, %71 : vector<2x128xi1>, vector<2x128xf32>
    %73 = math.log %72 : vector<2x128xf32>
    %cst_34 = arith.constant -1.000000e+02 : f32
    %74 = vector.broadcast %cst_34 : f32 to vector<2x128xf32>
    %75 = arith.maximumf %73, %74 : vector<2x128xf32>
    %76 = arith.subf %56, %75 : vector<2x128xf32>
    %c1_i32_35 = arith.constant 1 : i32
    %77 = vector.broadcast %c1_i32_35 : i32 to vector<2x128xi32>
    %78 = arith.cmpi eq, %21, %77 : vector<2x128xi32>
    %79 = arith.index_cast %arg0 : i32 to index
    %c1_36 = arith.constant 1 : index
    %80 = memref.load %arg2[%79, %c1_36] : memref<2x4xi32, #tpu.memory_space<smem>>
    %c0_i32_37 = arith.constant 0 : i32
    %81 = arith.cmpi ne, %80, %c0_i32_37 : i32
    %82 = vector.broadcast %81 : i1 to vector<2x128xi1>
    %83 = arith.andi %78, %82 : vector<2x128xi1>
    %c1_i32_38 = arith.constant 1 : i32
    %84 = arith.cmpi eq, %1, %c1_i32_38 : i32
    %85 = vector.broadcast %84 : i1 to vector<2x128xi1>
    %86 = arith.andi %85, %55 : vector<2x128xi1>
    %87 = arith.ori %83, %86 : vector<2x128xi1>
    %c0_39 = arith.constant 0 : index
    %c1_40 = arith.constant 1 : index
    %c0_41 = arith.constant 0 : index
    %c0_42 = arith.constant 0 : index
    %88 = vector.load %arg5[%c0_39, %c1_40, %c0_41, %c0_42] : memref<1x4x2x128xf32, #tpu.memory_space<vmem>>, vector<1x1x2x128xf32>
    %89 = vector.shape_cast %88 : vector<1x1x2x128xf32> to vector<2x128xf32>
    %cst_43 = arith.constant 1.000000e+00 : f32
    %90 = vector.broadcast %cst_43 : f32 to vector<2x128xf32>
    %91 = arith.subf %90, %89 : vector<2x128xf32>
    %92 = arith.select %87, %89, %91 : vector<2x128xi1>, vector<2x128xf32>
    %93 = math.log %92 : vector<2x128xf32>
    %cst_44 = arith.constant -1.000000e+02 : f32
    %94 = vector.broadcast %cst_44 : f32 to vector<2x128xf32>
    %95 = arith.maximumf %93, %94 : vector<2x128xf32>
    %96 = arith.subf %76, %95 : vector<2x128xf32>
    %c2_i32_45 = arith.constant 2 : i32
    %97 = vector.broadcast %c2_i32_45 : i32 to vector<2x128xi32>
    %98 = arith.cmpi eq, %21, %97 : vector<2x128xi32>
    %99 = arith.index_cast %arg0 : i32 to index
    %c2_46 = arith.constant 2 : index
    %100 = memref.load %arg2[%99, %c2_46] : memref<2x4xi32, #tpu.memory_space<smem>>
    %c0_i32_47 = arith.constant 0 : i32
    %101 = arith.cmpi ne, %100, %c0_i32_47 : i32
    %102 = vector.broadcast %101 : i1 to vector<2x128xi1>
    %103 = arith.andi %98, %102 : vector<2x128xi1>
    %c2_i32_48 = arith.constant 2 : i32
    %104 = arith.cmpi eq, %1, %c2_i32_48 : i32
    %105 = vector.broadcast %104 : i1 to vector<2x128xi1>
    %106 = arith.andi %105, %55 : vector<2x128xi1>
    %107 = arith.ori %103, %106 : vector<2x128xi1>
    %c0_49 = arith.constant 0 : index
    %c2_50 = arith.constant 2 : index
    %c0_51 = arith.constant 0 : index
    %c0_52 = arith.constant 0 : index
    %108 = vector.load %arg5[%c0_49, %c2_50, %c0_51, %c0_52] : memref<1x4x2x128xf32, #tpu.memory_space<vmem>>, vector<1x1x2x128xf32>
    %109 = vector.shape_cast %108 : vector<1x1x2x128xf32> to vector<2x128xf32>
    %cst_53 = arith.constant 1.000000e+00 : f32
    %110 = vector.broadcast %cst_53 : f32 to vector<2x128xf32>
    %111 = arith.subf %110, %109 : vector<2x128xf32>
    %112 = arith.select %107, %109, %111 : vector<2x128xi1>, vector<2x128xf32>
    %113 = math.log %112 : vector<2x128xf32>
    %cst_54 = arith.constant -1.000000e+02 : f32
    %114 = vector.broadcast %cst_54 : f32 to vector<2x128xf32>
    %115 = arith.maximumf %113, %114 : vector<2x128xf32>
    %116 = arith.subf %96, %115 : vector<2x128xf32>
    %c3_i32_55 = arith.constant 3 : i32
    %117 = vector.broadcast %c3_i32_55 : i32 to vector<2x128xi32>
    %118 = arith.cmpi eq, %21, %117 : vector<2x128xi32>
    %119 = arith.index_cast %arg0 : i32 to index
    %c3_56 = arith.constant 3 : index
    %120 = memref.load %arg2[%119, %c3_56] : memref<2x4xi32, #tpu.memory_space<smem>>
    %c0_i32_57 = arith.constant 0 : i32
    %121 = arith.cmpi ne, %120, %c0_i32_57 : i32
    %122 = vector.broadcast %121 : i1 to vector<2x128xi1>
    %123 = arith.andi %118, %122 : vector<2x128xi1>
    %c3_i32_58 = arith.constant 3 : i32
    %124 = arith.cmpi eq, %1, %c3_i32_58 : i32
    %125 = vector.broadcast %124 : i1 to vector<2x128xi1>
    %126 = arith.andi %125, %55 : vector<2x128xi1>
    %127 = arith.ori %123, %126 : vector<2x128xi1>
    %c0_59 = arith.constant 0 : index
    %c3_60 = arith.constant 3 : index
    %c0_61 = arith.constant 0 : index
    %c0_62 = arith.constant 0 : index
    %128 = vector.load %arg5[%c0_59, %c3_60, %c0_61, %c0_62] : memref<1x4x2x128xf32, #tpu.memory_space<vmem>>, vector<1x1x2x128xf32>
    %129 = vector.shape_cast %128 : vector<1x1x2x128xf32> to vector<2x128xf32>
    %cst_63 = arith.constant 1.000000e+00 : f32
    %130 = vector.broadcast %cst_63 : f32 to vector<2x128xf32>
    %131 = arith.subf %130, %129 : vector<2x128xf32>
    %132 = arith.select %127, %129, %131 : vector<2x128xi1>, vector<2x128xf32>
    %133 = math.log %132 : vector<2x128xf32>
    %cst_64 = arith.constant -1.000000e+02 : f32
    %134 = vector.broadcast %cst_64 : f32 to vector<2x128xf32>
    %135 = arith.maximumf %133, %134 : vector<2x128xf32>
    %136 = arith.subf %116, %135 : vector<2x128xf32>
    %c0_65 = arith.constant 0 : index
    %c0_66 = arith.constant 0 : index
    %c0_67 = arith.constant 0 : index
    %137 = vector.load %arg6[%c0_65, %c0_66, %c0_67] : memref<1x2x128xf32, #tpu.memory_space<vmem>>, vector<1x2x128xf32>
    %138 = vector.shape_cast %137 : vector<1x2x128xf32> to vector<2x128xf32>
    %139 = vector.shape_cast %136 : vector<2x128xf32> to vector<1x2x128xf32>
    tpu.vector_store %arg6[%c0_65, %c0_66, %c0_67], %139 {strides = array<i32>} : memref<1x2x128xf32, #tpu.memory_space<vmem>>, vector<1x2x128xf32>,
    return
  }
  func.func @transform_0(%arg0: i32, %arg1: i32, %arg2: memref<2x4xi32, #tpu.memory_space<smem>>, %arg3: memref<2xi32, #tpu.memory_space<smem>>) -> (i32, i32, i32, i32) {
    %c0_i32 = arith.constant 0 : i32
    %c0_i32_0 = arith.constant 0 : i32
    %c0_i32_1 = arith.constant 0 : i32
    return %arg0, %c0_i32, %arg1, %c0_i32_0 : i32, i32, i32, i32
  }
  func.func @transform_1(%arg0: i32, %arg1: i32, %arg2: memref<2x4xi32, #tpu.memory_space<smem>>, %arg3: memref<2xi32, #tpu.memory_space<smem>>) -> (i32, i32, i32, i32) {
    %c0_i32 = arith.constant 0 : i32
    %c0_i32_0 = arith.constant 0 : i32
    %c0_i32_1 = arith.constant 0 : i32
    return %arg0, %c0_i32, %arg1, %c0_i32_0 : i32, i32, i32, i32
  }
  func.func @transform_2(%arg0: i32, %arg1: i32, %arg2: memref<2x4xi32, #tpu.memory_space<smem>>, %arg3: memref<2xi32, #tpu.memory_space<smem>>) -> (i32, i32, i32) {
    %c0_i32 = arith.constant 0 : i32
    %c0_i32_0 = arith.constant 0 : i32
    return %arg0, %arg1, %c0_i32 : i32, i32, i32
  }
}

</mosaic_0001>

<bundles_post_ra>
// kernel: tpu_custom_call.1
= control target key start
LH: loop header
LB: loop body
LE: loop exit
PB: predicated region body
PF: predicated region fallthrough
CT: control target
= control target key end

     0   :  { %s733_s15 = smov [#allocation3]   ;;  %s1015_s0 = inlined_call_operand.hbm [shape: s32[2,4], index: 0, kind: input, shape index: {}]   ;;  %s1016_s2 = inlined_call_operand.hbm [shape: f32[2,4,2,128], index: 2, kind: input, shape index: {}]   ;;  %s1017_s3 = inlined_call_operand.hbm [shape: f32[2,4,2,128], index: 3, kind: input, shape index: {}]   ;;  %s1018_s4 = inlined_call_operand.hbm [shape: f32[2,2,128], index: 4, kind: output, shape index: {}]   ;;  %s1019_s1 = inlined_call_operand.vmem [shape: s32[2], index: 1, kind: input, shape index: {}]  }
   0x1   :  { %10 = dma.hbm_to_smem %s1015_s0, 32, %s733_s15, [#allocation2] }
   0x2   :  { %s11_s20 = sshll.u32 %s1019_s1, 4  ;;  %s12_s20 = int_to_ptr.vmem [resolvable:$true] %s11_s20 }
   0x3   :  { %s577_s21 = scalar_lea.vmem %s12_s20, 16  ;;  %p582_p1 = scmp.lt.s32.totalorder %s12_s20, %s12_s20 }
   0x4   :  { %p578_p0 = scmp.ne.s32.totalorder %s12_s20, %s577_s21  ;;  %p583_p2 = scmp.lt.s32.totalorder %s577_s21, %s577_s21 }
   0x6   :  { %p584_p3 = por %p583_p2, %p582_p1 }
   0x8   :  { %p585_p4 = pnand %p584_p3, %p578_p0 }
   0xa   :  { %588 = shalt.err (!%p585_p4)  }
   0xb   :  { %s734_s22 = smov [#allocation4]  }
   0xc   :  { %14 = dma.vmem_to_smem %s12_s20, 16, %s734_s22, [#allocation2] }
   0xd   :  { %695 = dma.done.wait [#allocation2], 48 }
   0xe   :  { %696 = vsyncadd [#allocation2], 4294967248 }
   0xf   :  { %16 = sfence }
  0x10   :  { %17 = vsyncpa [#allocation6], 0 }
  0x11   :  { %19 = vsyncpa [#allocation6 + $0x1], 0 }
  0x12   :  { %20 = vsyncpa [#allocation9], 0 }
  0x13   :  { %22 = vsyncpa [#allocation9 + $0x1], 0 }
  0x14   :  { %23 = vsyncpa [#allocation7], 0 }
  0x15   :  { %25 = vsyncpa [#allocation7 + $0x1], 0  ;;  %s773_s0 = smov 0   ;;  %s775_s1 = smov 0  }
  0x16   :  { %s777_s23 = smov 0   ;;  %s779_s24 = smov 0  }
  0x17   :  { %s781_s25 = smov 0   ;;  %s783_s26 = smov 0  }
  0x18 LB: > { %s461_s27 = sadd.s32 4294967295, %s731_s26   ;;  %s462_s28 = sadd.s32 4294967294, %s731_s26   ;;  %s731_s26 = sphi %s783_s26, %s31_s26   ;;  %s727_s25 = sphi %s781_s25, %s1041_s25   ;;  %s723_s24 = sphi %s779_s24, %s1040_s24   ;;  %s719_s23 = sphi %s777_s23, %s1039_s23   ;;  %s715_s1 = sphi %s775_s1, %s1038_s1   ;;  %s711_s0 = sphi %s773_s0, %s1037_s0  }
  0x19   : > { %s43_s29 = sadd.s32 1, %s727_s25  ;;  %s52_s30 = sadd.s32 1, %s719_s23 }
  0x1a   : > { %p45_p5 = scmp.ge.s32.totalorder %s43_s29, 2  ;;  %p59_p6 = scmp.ne.s32.totalorder %s719_s23, %s715_s1 }
  0x1b   : > { %p60_p7 = scmp.eq.s32.totalorder %s731_s26, 0  ;;  %p65_p8 = scmp.ne.s32.totalorder %s715_s1, %s711_s0 }
  0x1c   : > { %s1043_s29 = smov (%p45_p5, %s43_s29), 0  ;;  %p66_p10 = scmp.eq.s32.totalorder %s461_s27, 0 }
  0x1d   : > { %p814_p9 = por %p60_p7, %p59_p6  ;;  %s47_s6 = ssub.s32 %s727_s25, %s1043_s29 }
  0x1e   : > { %p119_p11 = scmp.eq.s32.totalorder %s461_s27, 1  ;;  %p50_p12 = scmp.eq.s32.totalorder %s47_s6, 0 }
  0x1f   : > { %p820_p13 = por %p66_p10, %p65_p8  ;;  %p125_p1 = scmp.eq.s32.totalorder %s462_s28, 1 }
  0x20   : > { %p824_p0 = por %p119_p11, %p59_p6  ;;  %p505_p4 = scmp.lt.s32.totalorder %s731_s26, 2 }
  0x21   : > { %s829_s9 = scalar_select %p50_p12, %s719_s23, %s52_s30  }
  0x22   : > { %p831_p2 = por %p125_p1, %p65_p8  ;;  %s838_s11 = sand.u32 1, %s719_s23  }
  0x23   : > { %s465_s12 = sshll.u32 %s838_s11, 3  ;;  %s486_s13 = sshll.u32 %s727_s25, 7 }
  0x24   : > { %s156_s16 = scalar_lea.hbm %s1016_s2, %s486_s13  ;;  %s149_s17 = scalar_lea.vmem [#allocation5], %s465_s12 }
  0x25   : > { %s157_s18 = sshll.u32 %s149_s17, 4  ;;  %p851_p5 = pnand %p505_p4, %p814_p9  ;;  %s158_s18 = int_to_ptr.vmem [resolvable:$true] %s157_s18 }
  0x26   : > { %p471_p6 = scmp.ge.s32.totalorder %s731_s26, 1  ;;  %s146_s20 = scalar_lea.sflag [#allocation6], %s838_s11 }
  0x27   : > { %p591_p7 = pneg %p851_p5  ;;  %s602_s21 = scalar_lea.vmem %s158_s18, 128 }
  0x28   : > { %p603_p8 = scmp.ne.s32.totalorder %s158_s18, %s602_s21  ;;  %s735_s22 = smov [#allocation5]  }
  0x29   : > { %s607_s27 = sshll.u32 %s735_s22, 4  ;;  %s608_s27 = int_to_ptr.vmem [resolvable:$false] %s607_s27 }
  0x2a   : > { %p605_p10 = pnand %p603_p8, %p591_p7  ;;  %s609_s28 = scalar_lea.vmem %s608_s27, 256 }
  0x2b   : > { %p610_p9 = scmp.lt.s32.totalorder %s158_s18, %s608_s27  ;;  %p611_p12 = scmp.lt.s32.totalorder %s609_s28, %s602_s21 }
  0x2c   : > { %p606_p11 = pneg %p605_p10 }
  0x2d   : > { %p612_p1 = por %p611_p12, %p610_p9 }
  0x2f   : > { %p613_p4 = pnand %p612_p1, %p606_p11 }
  0x31   : > { %616 = shalt.err (!%p613_p4)
}
  0x32   : > { %s736_s30 = smov 32   ;;  %s737_s5 = smov 2  }
  0x33   : > { %497 = dma.hbm_to_vmem [thread:$0]  (!%p851_p5), %s156_s16, 128, %s158_s18, %s146_s20, %s736_s30, %s736_s30, %s737_s5  }
  0x34   : > { %p187_p8 = scmp.lt.s32.totalorder %s731_s26, 3  ;;  %s178_s15 = scalar_lea.hbm %s1017_s3, %s486_s13 }
  0x35   : > { %s171_s21 = scalar_lea.vmem [#allocation8], %s465_s12  ;;  %s168_s27 = scalar_lea.sflag [#allocation9], %s838_s11 }
  0x36   : > { %p872_p10 = pnand %p471_p6, %p187_p8  ;;  %s179_s22 = sshll.u32 %s171_s21, 4  ;;  %s180_s22 = int_to_ptr.vmem [resolvable:$true] %s179_s22 }
  0x37   : > { %s630_s28 = scalar_lea.vmem %s180_s22, 128  ;;  %s738_s16 = smov [#allocation8]  }
  0x38   : > { %p631_p11 = scmp.ne.s32.totalorder %s180_s22, %s630_s28  ;;  %s635_s18 = sshll.u32 %s738_s16, 4  ;;  %s636_s18 = int_to_ptr.vmem [resolvable:$false] %s635_s18 }
  0x39   : > { %s637_s13 = scalar_lea.vmem %s636_s18, 256  ;;  %p638_p1 = scmp.lt.s32.totalorder %s180_s22, %s636_s18 }
  0x3a   : > { %p633_p9 = pnand %p631_p11, %p591_p7  ;;  %p639_p6 = scmp.lt.s32.totalorder %s637_s13, %s630_s28 }
  0x3c   : > { %p634_p12 = pneg %p633_p9  ;;  %p640_p4 = por %p639_p6, %p638_p1 }
  0x3e   : > { %p641_p8 = pnand %p640_p4, %p634_p12 }
  0x40   : > { %644 = shalt.err (!%p641_p8)
}
  0x41   : > { %500 = dma.hbm_to_vmem [thread:$0]  (!%p851_p5), %s178_s15, 128, %s180_s22, %s168_s27, %s736_s30, %s736_s30, %s737_s5  }
  0x42   : > { %191 = sbr.rel (%p872_p10) target bundleno = 138 (0x8a), region = 28  ;;  %s887_s11 = sand.u32 (!%p872_p10), 1, %s715_s1  }
  0x43   : > { %s472_s12 = sshll.u32 (!%p872_p10), %s887_s11, 3  ;;  %s194_s20 = scalar_lea.sflag (!%p872_p10), [#allocation6], %s887_s11 }
  0x44   : > { %s197_s6 = scalar_lea.vmem (!%p872_p10), [#allocation5], %s472_s12 }
  0x47   : > { %698 = dma.done.wait (%p820_p13), %s194_s20, 128  }
  0x48   : > { %700 = vsyncadd (%p820_p13), %s194_s20, 4294967168  ;;  %s203_s19 = scalar_lea.sflag [#allocation9], %s887_s11  ;;  %s896_s30 = scalar_lea.vmem [#allocation8], %s472_s12 }
  0x49   : > { %702 = dma.done.wait (%p820_p13), %s203_s19, 128  }
  0x4a   : > { %704 = vsyncadd (%p820_p13), %s203_s19, 4294967168  ;;  %s478_s5 = sshll.u32 %s723_s24, 7  ;;  %s904_s14 = sld [smem:[#allocation4 + %s723_s24]]  ;;  %v233_v0 = vld [vmem:[%s197_s6] sm:$0x3]  ;;  %v739_v4 = vmov 0  }
  0x4b   : > { %s250_s15 = sld [smem:[#allocation3 + %s478_s5]]  ;;  %s257_s17 = sadd.s32 1, %s478_s5  ;;  %v475_v1 = vld [vmem:[%s197_s6 + $0x2] sm:$0x3]  ;;  %v476_v2 = vld [vmem:[%s197_s6 + $0x4] sm:$0x3] }
  0x4c   : > { %s258_s21 = sld [smem:[#allocation3 + %s257_s17]]  ;;  %s266_s22 = sadd.s32 2, %s478_s5  ;;  %vm236_vm0 = vcmp.gt.f32.partialorder %v475_v1, %v233_v0  ;;  %v477_v6 = vld [vmem:[%s197_s6 + $0x6] sm:$0x3]  ;;  %v290_v18 = vld [vmem:[%s896_s30] sm:$0x3] }
  0x4d   : > { %s906_s27 = sld [smem:[#allocation3 + %s266_s22]]  ;;  %s275_s28 = sadd.s32 3, %s478_s5  ;;  %v237_v3 = vsel %vm236_vm0, %v475_v1, %v233_v0  ;;  %v238_v5 = vsel %vm236_vm0, 1, %v739_v4  ;;  %v479_v21 = vld [vmem:[%s896_s30 + $0x2] sm:$0x3]  ;;  %v291_v22 = vsub.f32 1.0, %v290_v18 }
  0x4e   : > { %s908_s16 = sld [smem:[#allocation3 + %s275_s28]]  ;;  %vm241_vm1 = vcmp.gt.f32.partialorder %v476_v2, %v237_v3  ;;  %v480_v25 = vld [vmem:[%s896_s30 + $0x4] sm:$0x3]  ;;  %v305_v26 = vsub.f32 1.0, %v479_v21  ;;  %v481_v28 = vld [vmem:[%s896_s30 + $0x6] sm:$0x3] }
  0x4f   : > { %v242_v7 = vsel %vm241_vm1, %v476_v2, %v237_v3  ;;  %v243_v8 = vsel %vm241_vm1, 2, %v238_v5  ;;  %v319_v30 = vsub.f32 1.0, %v480_v25  ;;  %v333_v32 = vsub.f32 1.0, %v481_v28  ;;  %s474_s30 = sshll.u32 %s887_s11, 1  ;;  %s483_s17 = sshll.u32 %s723_s24, 5 }
  0x50   : > { %p284_p5 = scmp.eq.s32.totalorder %s904_s14, 0  ;;  %p297_p10 = scmp.eq.s32.totalorder %s904_s14, 1  ;;  %vm246_vm2 = vcmp.gt.f32.partialorder %v477_v6, %v242_v7 }
  0x51   : > { %p251_p13 = scmp.ne.s32.totalorder %s250_s15, 0  ;;  %v247_v10 = vsel %vm246_vm2, 3, %v243_v8  ;;  %p311_p12 = scmp.eq.s32.totalorder %s904_s14, 2 }
  0x52   : > { %p259_p7 = scmp.ne.s32.totalorder %s258_s21, 0  ;;  %vm248_vm4 = vcmp.eq.s32.totalorder %v247_v10, 0  ;;  %vm256_vm5 = vcmp.eq.s32.totalorder %v247_v10, 1  ;;  %vm265_vm8 = vcmp.eq.s32.totalorder %v247_v10, 2  ;;  %vm274_vm12 = vcmp.eq.s32.totalorder %v247_v10, 3  ;;  %p325_p1 = scmp.eq.s32.totalorder %s904_s14, 3 }
  0x53   : > { %s252_s7 = scalar_select %p251_p13, 1, 0 }
  0x54   : > { %s260_s18 = scalar_select %p259_p7, 1, 0 }
  0x55   : > { %v253_v9 = vstv %s252_s7  ;;  %p268_p11 = scmp.ne.s32.totalorder %s906_s27, 0  ;;  %p277_p9 = scmp.ne.s32.totalorder %s908_s16, 0 }
  0x56   : > { %vm254_vm3 = vcmp.eq.s32.totalorder %v253_v9, 1  ;;  %v261_v11 = vstv %s260_s18  ;;  %s285_s13 = scalar_select %p284_p5, 1, 0 }
  0x57   : > { %vm262_vm6 = vcmp.eq.s32.totalorder %v261_v11, 1  ;;  %s269_s12 = scalar_select %p268_p11, 1, 0  ;;  %vm916_vm7 = vmand %vm248_vm4, %vm254_vm3  ;;  %vm740_vm3 = vmmov 1  }
  0x58   : > { %s278_s20 = scalar_select %p277_p9, 1, 0  ;;  %vm920_vm9 = vmand %vm256_vm5, %vm262_vm6  ;;  %v286_v16 = vstv %s285_s13 }
  0x59   : > { %v270_v14 = vstv %s269_s12  ;;  %s298_s6 = scalar_select %p297_p10, 1, 0  ;;  %vm264_vm10 = vmor %vm916_vm7, %vm920_vm9  ;;  %vm287_vm1 = vcmp.eq.s32.totalorder %v286_v16, 1 }
  0x5a   : > { %vm271_vm11 = vcmp.eq.s32.totalorder %v270_v14, 1  ;;  %v279_v15 = vstv %s278_s20  ;;  %s312_s19 = scalar_select %p311_p12, 1, 0 }
  0x5b   : > { %vm932_vm13 = vmand %vm265_vm8, %vm271_vm11  ;;  %vm280_vm14 = vcmp.eq.s32.totalorder %v279_v15, 1  ;;  %v299_v19 = vstv %s298_s6  ;;  %s326_s5 = scalar_select %p325_p1, 1, 0 }
  0x5c   : > { %vm273_vm15 = vmor %vm264_vm10, %vm932_vm13  ;;  %v313_v23 = vstv %s312_s19  ;;  %vm300_vm5 = vcmp.eq.s32.totalorder %v299_v19, 1  ;;  %s231_s14 = scalar_lea.vmem [#allocation10], %s474_s30  ;;  %s353_s27 = scalar_lea.hbm %s1018_s4, %s483_s17 }
  0x5d   : > { %vm939_vm0 = vmand %vm274_vm12, %vm280_vm14  ;;  %v327_v27 = vstv %s326_s5  ;;  %vm314_vm10 = vcmp.eq.s32.totalorder %v313_v23, 1  ;;  %s355_s15 = sshll.u32 %s231_s14, 4  ;;  %s341_s28 = scalar_lea.sflag [#allocation7], %s887_s11  ;;  %s970_s15 = int_to_ptr.vmem [resolvable:$true] %s355_s15 }
  0x5e   : > { %vm282_vm2 = vmor %vm273_vm15, %vm939_vm0  ;;  %vm328_vm14 = vcmp.eq.s32.totalorder %v327_v27, 1  ;;  %s645_s16 = scalar_lea.vmem %s970_s15, 32  ;;  %s741_s24 = smov [#allocation10]  }
  0x5f   : > { %vm946_vm4 = vmxor %vm282_vm2, %vm740_vm3  ;;  %p646_p6 = scmp.ne.s32.totalorder %s970_s15, %s645_s16  ;;  %s649_s7 = sshll.u32 %s741_s24, 4  ;;  %s650_s7 = int_to_ptr.vmem [resolvable:$false] %s649_s7 }
  0x60   : > { %vm288_vm6 = vmand %vm287_vm1, %vm946_vm4  ;;  %s651_s18 = scalar_lea.vmem %s650_s7, 64  ;;  %p652_p13 = scmp.lt.s32.totalorder %s970_s15, %s650_s7 }
  0x61   : > { %vm289_vm8 = vmor %vm916_vm7, %vm288_vm6  ;;  %p647_p4 = pnand %p646_p6, %p824_p0  ;;  %p653_p5 = scmp.lt.s32.totalorder %s651_s18, %s645_s16 }
  0x62   : > { %v292_v29 = vsel %vm289_vm8, %v290_v18, %v291_v22  ;;  %vm301_vm11 = vmand %vm300_vm5, %vm946_vm4 }
  0x63   : > { %561 = vlog2.f32 %v292_v29  ;;  %vm302_vm12 = vmor %vm920_vm9, %vm301_vm11  ;;  %p648_p8 = pneg %p647_p4  ;;  %p654_p7 = por %p653_p5, %p652_p13 }
  0x64   : > { %v306_v31 = vsel %vm302_vm12, %v479_v21, %v305_v26  ;;  %vm315_vm15 = vmand %vm314_vm10, %vm946_vm4 }
  0x65   : > { %563 = vlog2.f32 %v306_v31  ;;  %vm316_vm7 = vmor %vm932_vm13, %vm315_vm15  ;;  %p655_p10 = pnand %p654_p7, %p648_p8 }
  0x66   : > { %v320_v33 = vsel %vm316_vm7, %v480_v25, %v319_v30  ;;  %vm329_vm1 = vmand %vm328_vm14, %vm946_vm4 }
  0x67   : > { %565 = vlog2.f32 %v320_v33  ;;  %vm330_vm2 = vmor %vm939_vm0, %vm329_vm1 }
  0x68   : > { %v334_v34 = vsel %vm330_vm2, %v481_v28, %v333_v32 }
  0x69   : > { %567 = vlog2.f32 %v334_v34 }
  0x70   : > { %v562_v35 = vpop.eup %561 }
  0x71   : > { %v294_v36 = vmul.f32 0.6931472, %v562_v35 }
  0x72   : > { %v564_v37 = vpop.eup %563 }
  0x73   : > { %v295_v38 = vmax.f32 %v294_v36, -100.0  ;;  %v308_v39 = vmul.f32 0.6931472, %v564_v37 }
  0x74   : > { %v566_v40 = vpop.eup %565 }
  0x75   : > { %v296_v41 = vsub.f32 0.0, %v295_v38  ;;  %v309_v42 = vmax.f32 %v308_v39, -100.0  ;;  %v322_v43 = vmul.f32 0.6931472, %v566_v40 }
  0x76   : > { %v568_v44 = vpop.eup %567 }
  0x77   : > { %v310_v45 = vsub.f32 %v296_v41, %v309_v42  ;;  %v323_v46 = vmax.f32 %v322_v43, -100.0  ;;  %v336_v47 = vmul.f32 0.6931472, %v568_v44 }
  0x79   : > { %v324_v48 = vsub.f32 %v310_v45, %v323_v46  ;;  %v337_v49 = vmax.f32 %v336_v47, -100.0 }
  0x7b   : > { %v338_v50 = vsub.f32 %v324_v48, %v337_v49 }
  0x7d   : > { %339 = vst [vmem:[%s231_s14] sm:$0x3] %v338_v50 }
  0x7e   : > { %658 = shalt.err (!%p655_p10)
}
  0x7f   : > { %s659_s13 = scalar_lea.hbm %s353_s27, 32  ;;  %s663_s20 = scalar_lea.hbm %s1018_s4, 64 }
  0x80   : > { %p660_p11 = scmp.ne.s32.totalorder %s353_s27, %s659_s13  ;;  %p664_p1 = scmp.lt.s32.totalorder %s353_s27, %s1018_s4 }
  0x81   : > { %p665_p6 = scmp.lt.s32.totalorder %s663_s20, %s659_s13 }
  0x82   : > { %p661_p9 = pnand %p660_p11, %p824_p0 }
  0x83   : > { %p666_p4 = por %p665_p6, %p664_p1 }
  0x84   : > { %p662_p12 = pneg %p661_p9 }
  0x86   : > { %p667_p3 = pnand %p666_p4, %p662_p12 }
  0x88   : > { %670 = shalt.err (!%p667_p3)
}
  0x89   : > { %492 = dma.vmem_to_hbm [thread:$0]  (%p824_p0), %s970_s15, 32, %s353_s27, %s341_s28  }
  0x8a PF: > { %s367_s5 = sand.u32 1, %s711_s0   ;;  %p1036_p8 = scmp.ge.s32.totalorder %s731_s26, 2 }
  0x8b   : > { %s368_s30 = scalar_lea.sflag [#allocation7], %s367_s5 }
  0x8c   : > { %p502_p13 = pnand %p1036_p8, %p831_p2 }
  0x8e   : > { %p503_p5 = pneg %p502_p13 }
  0x90   : > { %706 = dma.done.wait (%p503_p5), %s368_s30, 32  }
  0x91   : > { %708 = vsyncadd (%p503_p5), %s368_s30, 4294967264  ;;  %s31_s26 = sadd.s32 1, %s731_s26   ;;  %s1037_s0 = smov %s715_s1 }
  0x92   : > { %p28_p7 = scmp.ge.s32.totalorder %s31_s26, 4   ;;  %s1038_s1 = smov %s719_s23 }
  0x93   : > { %s1039_s23 = smov %s829_s9  ;;  %s1040_s24 = smov %s727_s25 }
  0x94   : > { %s1041_s25 = smov %s1043_s29  ;;  %30 = sbr.rel (!%p28_p7) target bundleno = 24 (0x18), region = 92 }
  0x99   :  { %373 = vsyncpa [#allocation6], 1 }
  0x9a   :  { %375 = vsyncpa [#allocation6 + $0x1], 1 }
  0x9b   :  { %376 = vsyncpa [#allocation9], 1 }
  0x9c   :  { %378 = vsyncpa [#allocation9 + $0x1], 1 }
  0x9d   :  { %379 = vsyncpa [#allocation7], 1 }
  0x9e   :  { %381 = vsyncpa [#allocation7 + $0x1], 1 }

</bundles_post_ra>
